<compile_context>
chip_gen: v6e
topology: v6e:2x2x1
jax: 0.10.0
libtpu: 0.0.40
codegen_flags: <defaults>
</compile_context>

<pallas_src>
import math

import jax
import jax.numpy as jnp
from jax import lax
from jax.experimental import pallas as pl
from jax.experimental.pallas import tpu as pltpu


def _build_embedding(num_steps: int, dim: int) -> jnp.ndarray:
    """Matches DiffusionEmbedding._build_embedding (dim = embedding_dim / 2)."""
    steps = jnp.arange(num_steps, dtype=jnp.float32)[:, None]                  # (T, 1)
    freqs = 10.0 ** (jnp.arange(dim, dtype=jnp.float32) / (dim - 1) * 4.0)[None, :]
    table = steps * freqs                                                      # (T, dim)
    return jnp.concatenate([jnp.sin(table), jnp.cos(table)], axis=1)           # (T, 2*dim)


def _diffusion_embedding_kernel(step_ref, table_ref, w_ref, b_ref, o_ref):
    # step_ref : VMEM (B, 1)    int32   diffusion step indices
    # table_ref: VMEM (T, E)    f32     sinusoidal table (natural dense layout)
    # w_ref    : VMEM (E+P, P)  f32     [W1 (E,P) ; W2 (P,P)] stacked along rows
    # b_ref    : VMEM (2, P)    f32     [b1 ; b2]
    # o_ref    : VMEM (B, P)    f32
    B = step_ref.shape[0]
    T, E = table_ref.shape
    P = o_ref.shape[1]

    # Fused embedding-row gather as a one-hot matmul (MXU): (B,T) @ (T,E) -> (B,E).
    steps = step_ref[...]                                              # (B, 1) int32
    iota_t = lax.broadcasted_iota(jnp.int32, (B, T), 1)                # (B, T)
    onehot = (iota_t == steps).astype(jnp.float32)                     # (B, T)
    x = jnp.dot(onehot, table_ref[...], preferred_element_type=jnp.float32)  # (B, E)

    # Static (zero-cost) slices of the stacked weight / bias arrays.
    w1 = w_ref[0:E, :]          # (E, P)
    w2 = w_ref[E:E + P, :]      # (P, P)
    b1 = b_ref[0:1, :]          # (1, P)
    b2 = b_ref[1:2, :]          # (1, P)

    # Linear 1 + SiLU (f32 MXU, f32 VPU/EUP — v5e-safe).
    h = jnp.dot(x, w1, preferred_element_type=jnp.float32) + b1
    h = h * jax.nn.sigmoid(h)

    # Linear 2 + SiLU.
    y = jnp.dot(h, w2, preferred_element_type=jnp.float32) + b2
    y = y * jax.nn.sigmoid(y)

    o_ref[...] = y.astype(o_ref.dtype)


@jax.jit
def diffusion_embedding_forward(diffusion_step, embedding, w1, b1, w2, b2):
    """diffusion_step: int32 (B,). embedding: (T, E) f32.
    w1: (E, P), w2: (P, P) f32 (stored (in, out), i.e. PyTorch weight.T).
    b1, b2: (P,) f32. Returns (B, P) float32."""
    # TODO(synk): only the integer-step indexing path is implemented (matches the
    # given PyTorch forward; no float-step interpolation variant exists in the spec).
    B = diffusion_step.shape[0]
    T, E = embedding.shape
    P = w1.shape[1]

    # Clamp indices so out-of-range steps can't silently change semantics
    # (the in-kernel one-hot gather is memory-safe regardless).
    steps2d = jnp.clip(diffusion_step.astype(jnp.int32), 0, T - 1).reshape(B, 1)

    # Collapse 6 input DMAs into 4: stacked weights and stacked biases.
    w_stack = jnp.concatenate([w1, w2], axis=0)                         # (E+P, P)
    b_stack = jnp.stack([b1, b2], axis=0)                               # (2, P)

    flops = 2 * B * (T * E + E * P + P * P)
    transcendentals = 2 * B * P
    bytes_accessed = 4 * (B * 1 + T * E + (E + P) * P + 2 * P + B * P)

    vmem = pl.BlockSpec(memory_space=pltpu.MemorySpace.VMEM)
    return pl.pallas_call(
        _diffusion_embedding_kernel,
        out_shape=jax.ShapeDtypeStruct((B, P), jnp.float32),
        in_specs=[vmem, vmem, vmem, vmem],
        out_specs=vmem,
        cost_estimate=pl.CostEstimate(
            flops=flops,
            transcendentals=transcendentals,
            bytes_accessed=bytes_accessed,
        ),
    )(steps2d, embedding, w_stack, b_stack)


if __name__ == "__main__":
    num_steps = 50
    embedding_dim = 128
    projection_dim = 128
    batch = 8

    key = jax.random.PRNGKey(0)
    k1, k2, k3, k4, k5 = jax.random.split(key, 5)

    # nn.Linear-style init: U(-1/sqrt(fan_in), 1/sqrt(fan_in)); weights stored
    # pre-transposed as (in, out), f32 throughout.
    bound1 = 1.0 / math.sqrt(embedding_dim)
    w1 = jax.random.uniform(k1, (embedding_dim, projection_dim),
                            jnp.float32, -bound1, bound1)
    b1 = jax.random.uniform(k2, (projection_dim,), jnp.float32, -bound1, bound1)

    bound2 = 1.0 / math.sqrt(projection_dim)
    w2 = jax.random.uniform(k3, (projection_dim, projection_dim),
                            jnp.float32, -bound2, bound2)
    b2 = jax.random.uniform(k4, (projection_dim,), jnp.float32, -bound2, bound2)

    embedding = _build_embedding(num_steps, embedding_dim // 2)   # (50, 128) f32
    diffusion_step = jax.random.randint(k5, (batch,), 0, num_steps, jnp.int32)

    out = diffusion_embedding_forward(diffusion_step, embedding, w1, b1, w2, b2)
    out = jax.block_until_ready(out)

    # Pure-JAX f32 reference (matches the PyTorch module's math).
    x_ref = embedding[diffusion_step]
    h_ref = jax.nn.silu(x_ref @ w1 + b1)
    y_ref = jax.nn.silu(h_ref @ w2 + b2)

    assert out.shape == (batch, projection_dim)
    assert jnp.allclose(out, y_ref, atol=2e-3, rtol=2e-3), \
        float(jnp.max(jnp.abs(out - y_ref)))

    print("KERNEL_OK")
</pallas_src>

<mosaic_0001>
module attributes {stable_mosaic.version = 11 : i64} {
  func.func @_diffusion_embedding_kernel(%arg0: memref<8x1xi32, #tpu.memory_space<vmem>>, %arg1: memref<50x128xf32, #tpu.memory_space<vmem>>, %arg2: memref<256x128xf32, #tpu.memory_space<vmem>>, %arg3: memref<2x128xf32, #tpu.memory_space<vmem>>, %arg4: memref<8x128xf32, #tpu.memory_space<vmem>>) attributes {dimension_semantics = [], scalar_prefetch = 0 : i64, scratch_operands = 0 : i64, tpu.core_type = #tpu.core_type<tc>} {
    %c0 = arith.constant 0 : index
    %c0_0 = arith.constant 0 : index
    %0 = vector.load %arg0[%c0, %c0_0] : memref<8x1xi32, #tpu.memory_space<vmem>>, vector<8x1xi32>
    %1 = tpu.iota {dimensions = array<i32: 1>} : vector<8x50xi32>
    %2 = vector.broadcast %0 : vector<8x1xi32> to vector<8x50xi32>
    %3 = arith.cmpi eq, %1, %2 : vector<8x50xi32>
    %4 = arith.extui %3 : vector<8x50xi1> to vector<8x50xi32>
    %5 = arith.sitofp %4 : vector<8x50xi32> to vector<8x50xf32>
    %c0_1 = arith.constant 0 : index
    %c0_2 = arith.constant 0 : index
    %6 = vector.load %arg1[%c0_1, %c0_2] : memref<50x128xf32, #tpu.memory_space<vmem>>, vector<50x128xf32>
    %cst = arith.constant dense<0.000000e+00> : vector<8x128xf32>
    %7 = tpu.matmul %5, %6, %cst {dimension_numbers = #tpu.dot_dimension_numbers<[1], [0], [0], [1], [0, 0, 1, 1], [], []>} : vector<8x50xf32>, vector<50x128xf32>, vector<8x128xf32> -> vector<8x128xf32>
    %c0_3 = arith.constant 0 : index
    %c0_4 = arith.constant 0 : index
    %8 = vector.load %arg2[%c0_3, %c0_4] : memref<256x128xf32, #tpu.memory_space<vmem>>, vector<128x128xf32>
    %c128 = arith.constant 128 : index
    %c0_5 = arith.constant 0 : index
    %9 = vector.load %arg2[%c128, %c0_5] : memref<256x128xf32, #tpu.memory_space<vmem>>, vector<128x128xf32>
    %c0_6 = arith.constant 0 : index
    %c0_7 = arith.constant 0 : index
    %10 = vector.load %arg3[%c0_6, %c0_7] : memref<2x128xf32, #tpu.memory_space<vmem>>, vector<1x128xf32>
    %c1 = arith.constant 1 : index
    %c0_8 = arith.constant 0 : index
    %11 = vector.load %arg3[%c1, %c0_8] : memref<2x128xf32, #tpu.memory_space<vmem>>, vector<1x128xf32>
    %cst_9 = arith.constant dense<0.000000e+00> : vector<8x128xf32>
    %12 = tpu.matmul %7, %8, %cst_9 {dimension_numbers = #tpu.dot_dimension_numbers<[1], [0], [0], [1], [0, 0, 1, 1], [], []>} : vector<8x128xf32>, vector<128x128xf32>, vector<8x128xf32> -> vector<8x128xf32>
    %13 = vector.broadcast %10 : vector<1x128xf32> to vector<8x128xf32>
    %14 = arith.addf %12, %13 : vector<8x128xf32>
    %15 = arith.negf %14 : vector<8x128xf32>
    %16 = math.exp %15 : vector<8x128xf32>
    %cst_10 = arith.constant 1.000000e+00 : f32
    %17 = vector.broadcast %cst_10 : f32 to vector<8x128xf32>
    %18 = arith.addf %17, %16 : vector<8x128xf32>
    %19 = arith.divf %17, %18 : vector<8x128xf32>
    %20 = arith.mulf %14, %19 : vector<8x128xf32>
    %cst_11 = arith.constant dense<0.000000e+00> : vector<8x128xf32>
    %21 = tpu.matmul %20, %9, %cst_11 {dimension_numbers = #tpu.dot_dimension_numbers<[1], [0], [0], [1], [0, 0, 1, 1], [], []>} : vector<8x128xf32>, vector<128x128xf32>, vector<8x128xf32> -> vector<8x128xf32>
    %22 = vector.broadcast %11 : vector<1x128xf32> to vector<8x128xf32>
    %23 = arith.addf %21, %22 : vector<8x128xf32>
    %24 = arith.negf %23 : vector<8x128xf32>
    %25 = math.exp %24 : vector<8x128xf32>
    %cst_12 = arith.constant 1.000000e+00 : f32
    %26 = vector.broadcast %cst_12 : f32 to vector<8x128xf32>
    %27 = arith.addf %26, %25 : vector<8x128xf32>
    %28 = arith.divf %26, %27 : vector<8x128xf32>
    %29 = arith.mulf %23, %28 : vector<8x128xf32>
    %c0_13 = arith.constant 0 : index
    %c0_14 = arith.constant 0 : index
    %30 = vector.load %arg4[%c0_13, %c0_14] : memref<8x128xf32, #tpu.memory_space<vmem>>, vector<8x128xf32>
    tpu.vector_store %arg4[%c0_13, %c0_14], %29 {strides = array<i32>} : memref<8x128xf32, #tpu.memory_space<vmem>>, vector<8x128xf32>,
    return
  }
}

</mosaic_0001>

<bundles_post_ra>
// kernel: diffusion_embedding_forward.1
= control target key start
LH: loop header
LB: loop body
LE: loop exit
PB: predicated region body
PF: predicated region fallthrough
CT: control target
= control target key end

     0   :  { %vm38_vm0 = vcmask 1041408   ;;  %v494_v2 = vmov 0   ;;  %v495_v3 = vmov 0.0   ;;  %vm496_vm1 = vmmov 0   ;;  %s698_s0 = inlined_call_operand.vmem [shape: s32[8,1], index: 0, kind: input, shape index: {}]   ;;  %s699_s1 = inlined_call_operand.vmem [shape: f32[50,128], index: 1, kind: input, shape index: {}]   ;;  %s700_s2 = inlined_call_operand.vmem [shape: f32[256,128], index: 2, kind: input, shape index: {}]   ;;  %s701_s3 = inlined_call_operand.vmem [shape: f32[2,128], index: 3, kind: input, shape index: {}]   ;;  %s702_s4 = inlined_call_operand.hbm [shape: f32[8,128], index: 4, kind: output, shape index: {}]  }
   0x1   :  { %v18_v0 = vld [vmem:[%s698_s0] sm:$0xff]  ;;  %v33_v1 = vld [vmem:[%s699_s1 + $0x30] sm:$0x3]  ;;  %463 = vset.pattern.permute.xlu0 %v494_v2  ;;  %372 = vmatprep.subr.mxu0 %v495_v3  ;;  %v32_v4 = vld [vmem:[%s699_s1 + $0x28] sm:$0xff] }
   0x2   :  { %22 = vperm.xlu0 %463, %v18_v0   ;;  %373 = vmatpush3.msk.msra.mxu0 %vm38_vm0, %v33_v1  ;;  %v31_v5 = vld [vmem:[%s699_s1 + $0x20] sm:$0xff]  ;;  %v127_v6 = vld [vmem:[%s700_s2 + $0x78] sm:$0xff]  ;;  %v126_v7 = vld [vmem:[%s700_s2 + $0x70] sm:$0xff] }
   0x3   :  { %374 = vmatprep.subr.mxu0 %v495_v3  ;;  %386 = vmatprep.mubr.msk.f32.mxu0 %vm496_vm1, %v495_v3  ;;  %v30_v8 = vld [vmem:[%s699_s1 + $0x18] sm:$0xff]  ;;  %v125_v9 = vld [vmem:[%s700_s2 + $0x68] sm:$0xff]  ;;  %v29_v10 = vld [vmem:[%s699_s1 + $0x10] sm:$0xff] }
   0x4   :  { %375 = vmatpush3.msra.mxu0 %v32_v4  ;;  %389 = vmatprep.subr.mxu1 %v495_v3  ;;  %v124_v11 = vld [vmem:[%s700_s2 + $0x60] sm:$0xff] }
   0x5   :  { %376 = vmatprep.subr.mxu0 %v495_v3  ;;  %390 = vmatpush3.msra.mxu1 %v127_v6 }
   0x6   :  { %377 = vmatpush3.msra.mxu0 %v31_v5  ;;  %391 = vmatprep.subr.mxu1 %v495_v3 }
   0x7   :  { %378 = vmatprep.subr.mxu0 %v495_v3  ;;  %392 = vmatpush3.msra.mxu1 %v126_v7 }
   0x8   :  { %379 = vmatpush3.msra.mxu0 %v30_v8  ;;  %393 = vmatprep.subr.mxu1 %v495_v3 }
   0x9   :  { %9 = vsyncpa [#allocation3], 0  ;;  %380 = vmatprep.subr.mxu0 %v495_v3  ;;  %v28_v12 = vld [vmem:[%s699_s1 + $0x8] sm:$0xff]  ;;  %394 = vmatpush3.msra.mxu1 %v125_v9  ;;  %v123_v13 = vld [vmem:[%s700_s2 + $0x58] sm:$0xff]  ;;  %v19_v25 = vlaneseq  ;;  %vm34_vm2 = vcmask 408576  }
   0xa   :  { %381 = vmatpush3.msra.mxu0 %v29_v10  ;;  %395 = vmatprep.subr.mxu1 %v495_v3  ;;  %v27_v14 = vld [vmem:[%s699_s1] sm:$0xff]  ;;  %v122_v15 = vld [vmem:[%s700_s2 + $0x50] sm:$0xff]  ;;  %v121_v16 = vld [vmem:[%s700_s2 + $0x48] sm:$0xff] }
   0xb   :  { %382 = vmatprep.subr.mxu0 %v495_v3  ;;  %396 = vmatpush3.msra.mxu1 %v124_v11  ;;  %v120_v17 = vld [vmem:[%s700_s2 + $0x40] sm:$0xff]  ;;  %v119_v18 = vld [vmem:[%s700_s2 + $0x38] sm:$0xff]  ;;  %v118_v19 = vld [vmem:[%s700_s2 + $0x30] sm:$0xff]  ;;  %v20_v26 = vand.u32 127, %v19_v25 }
   0xc   :  { %383 = vmatpush3.msra.mxu0 %v28_v12  ;;  %397 = vmatprep.subr.mxu1 %v495_v3  ;;  %v117_v20 = vld [vmem:[%s700_s2 + $0x28] sm:$0xff]  ;;  %v116_v21 = vld [vmem:[%s700_s2 + $0x20] sm:$0xff]  ;;  %v115_v22 = vld [vmem:[%s700_s2 + $0x18] sm:$0xff] }
   0xd   :  { %384 = vmatprep.subr.mxu0 %v495_v3  ;;  %398 = vmatpush3.msra.mxu1 %v123_v13  ;;  %v114_v23 = vld [vmem:[%s700_s2 + $0x10] sm:$0xff]  ;;  %v113_v24 = vld [vmem:[%s700_s2 + $0x8] sm:$0xff]  ;;  %v112_v29 = vld [vmem:[%s700_s2] sm:$0xff] }
   0xe   :  { %385 = vmatpush3.msra.mxu0 %v27_v14  ;;  %399 = vmatprep.subr.mxu1 %v495_v3  ;;  %v143_v32 = vld [vmem:[%s700_s2 + $0xf8] sm:$0xff]  ;;  %v142_v33 = vld [vmem:[%s700_s2 + $0xf0] sm:$0xff]  ;;  %v141_v34 = vld [vmem:[%s700_s2 + $0xe8] sm:$0xff] }
   0xf   :  { %400 = vmatpush3.msra.mxu1 %v122_v15  ;;  %421 = vmatprep.mubr.msk.f32.mxu1 %vm496_vm1, %v495_v3  ;;  %v140_v35 = vld [vmem:[%s700_s2 + $0xe0] sm:$0xff]  ;;  %v139_v36 = vld [vmem:[%s700_s2 + $0xd8] sm:$0xff]  ;;  %v138_v37 = vld [vmem:[%s700_s2 + $0xd0] sm:$0xff] }
  0x10   :  { %401 = vmatprep.subr.mxu1 %v495_v3  ;;  %424 = vmatprep.subr.mxu0 %v495_v3  ;;  %v137_v38 = vld [vmem:[%s700_s2 + $0xc8] sm:$0xff]  ;;  %v136_v39 = vld [vmem:[%s700_s2 + $0xc0] sm:$0xff]  ;;  %v135_v40 = vld [vmem:[%s700_s2 + $0xb8] sm:$0xff] }
  0x11   :  { %402 = vmatpush3.msra.mxu1 %v121_v16  ;;  %v134_v41 = vld [vmem:[%s700_s2 + $0xb0] sm:$0xff]  ;;  %v133_v42 = vld [vmem:[%s700_s2 + $0xa8] sm:$0xff]  ;;  %v132_v43 = vld [vmem:[%s700_s2 + $0xa0] sm:$0xff] }
  0x12   :  { %403 = vmatprep.subr.mxu1 %v495_v3  ;;  %v131_v44 = vld [vmem:[%s700_s2 + $0x98] sm:$0xff]  ;;  %v130_v45 = vld [vmem:[%s700_s2 + $0x90] sm:$0xff]  ;;  %v129_v46 = vld [vmem:[%s700_s2 + $0x88] sm:$0xff] }
  0x13   :  { %404 = vmatpush3.msra.mxu1 %v120_v17  ;;  %v128_v47 = vld [vmem:[%s700_s2 + $0x80] sm:$0xff]  ;;  %s497_s2 = smov [#allocation2]  }
  0x14   :  { %405 = vmatprep.subr.mxu1 %v495_v3  ;;  %v326_v48 = vld [vmem:[%s701_s3] ss:$0 sm:$0xff]  ;;  %v328_v57 = vld [vmem:[%s701_s3 + $0x1] ss:$0 sm:$0xff]  ;;  %s315_s16 = sshll.u32 %s497_s2, 4  ;;  %s316_s16 = int_to_ptr.vmem [resolvable:$true] %s315_s16 }
  0x15   :  { %406 = vmatpush3.msra.mxu1 %v119_v18  ;;  %s472_s17 = scalar_lea.vmem %s316_s16, 128  ;;  %p477_p1 = scmp.lt.s32.totalorder %s316_s16, %s316_s16 }
  0x16   :  { %407 = vmatprep.subr.mxu1 %v495_v3  ;;  %p473_p0 = scmp.ne.s32.totalorder %s316_s16, %s472_s17  ;;  %p478_p2 = scmp.lt.s32.totalorder %s472_s17, %s472_s17 }
  0x17   :  { %408 = vmatpush3.msra.mxu1 %v118_v19 }
  0x18   :  { %409 = vmatprep.subr.mxu1 %v495_v3  ;;  %p479_p3 = por %p478_p2, %p477_p1 }
  0x19   :  { %410 = vmatpush3.msra.mxu1 %v117_v20 }
  0x1a   :  { %411 = vmatprep.subr.mxu1 %v495_v3  ;;  %p480_p4 = pnand %p479_p3, %p473_p0 }
  0x1b   :  { %412 = vmatpush3.msra.mxu1 %v116_v21 }
  0x1c   :  { %413 = vmatprep.subr.mxu1 %v495_v3 }
  0x1d   :  { %414 = vmatpush3.msra.mxu1 %v115_v22 }
  0x1e   :  { %415 = vmatprep.subr.mxu1 %v495_v3 }
  0x1f   :  { %416 = vmatpush3.msra.mxu1 %v114_v23 }
  0x20   :  { %417 = vmatprep.subr.mxu1 %v495_v3 }
  0x21   :  { %418 = vmatpush3.msra.mxu1 %v113_v24 }
  0x22   :  { %419 = vmatprep.subr.mxu1 %v495_v3 }
  0x23   :  { %420 = vmatpush3.msra.mxu1 %v112_v29 }
  0x7d   :  { %v23_v27 = vpop.permute.xlu0 %22 }
  0x7e   :  { %vm24_vm3 = vcmp.eq.s32.totalorder %v20_v26, %v23_v27 }
  0x7f   :  { %v323_v28 = vsel %vm24_vm3, 1.0, %v495_v3 }
  0x80   :  { %387 = vmatmul.mubr.msk.f32.vlgmr.msra.gmra.mxu0 %vm34_vm2, %v323_v28 }
  0x81   :  { %456 = vmatprep.mubr.msk.f32.mxu0 %vm496_vm1, %v495_v3  ;;  %425 = vmatpush3.msra.mxu0 %v143_v32 }
  0x82   :  { %426 = vmatprep.subr.mxu0 %v495_v3 }
  0x83   :  { %427 = vmatpush3.msra.mxu0 %v142_v33 }
  0x84   :  { %428 = vmatprep.subr.mxu0 %v495_v3 }
  0x85   :  { %429 = vmatpush3.msra.mxu0 %v141_v34 }
  0x86   :  { %430 = vmatprep.subr.mxu0 %v495_v3 }
  0x87   :  { %431 = vmatpush3.msra.mxu0 %v140_v35 }
  0x88   :  { %432 = vmatprep.subr.mxu0 %v495_v3 }
  0x89   :  { %433 = vmatpush3.msra.mxu0 %v139_v36 }
  0x8a   :  { %434 = vmatprep.subr.mxu0 %v495_v3 }
  0x8b   :  { %435 = vmatpush3.msra.mxu0 %v138_v37 }
  0x8c   :  { %436 = vmatprep.subr.mxu0 %v495_v3 }
  0x8d   :  { %437 = vmatpush3.msra.mxu0 %v137_v38 }
  0x8e   :  { %438 = vmatprep.subr.mxu0 %v495_v3 }
  0x8f   :  { %439 = vmatpush3.msra.mxu0 %v136_v39 }
  0x90   :  { %440 = vmatprep.subr.mxu0 %v495_v3 }
  0x91   :  { %441 = vmatpush3.msra.mxu0 %v135_v40 }
  0x92   :  { %442 = vmatprep.subr.mxu0 %v495_v3 }
  0x93   :  { %443 = vmatpush3.msra.mxu0 %v134_v41 }
  0x94   :  { %444 = vmatprep.subr.mxu0 %v495_v3 }
  0x95   :  { %445 = vmatpush3.msra.mxu0 %v133_v42 }
  0x96   :  { %446 = vmatprep.subr.mxu0 %v495_v3 }
  0x97   :  { %447 = vmatpush3.msra.mxu0 %v132_v43 }
  0x98   :  { %448 = vmatprep.subr.mxu0 %v495_v3 }
  0x99   :  { %449 = vmatpush3.msra.mxu0 %v131_v44 }
  0x9a   :  { %450 = vmatprep.subr.mxu0 %v495_v3 }
  0x9b   :  { %451 = vmatpush3.msra.mxu0 %v130_v45 }
  0x9c   :  { %452 = vmatprep.subr.mxu0 %v495_v3 }
  0x9d   :  { %453 = vmatpush3.msra.mxu0 %v129_v46 }
  0x9e   :  { %454 = vmatprep.subr.mxu0 %v495_v3 }
  0x9f   :  { %455 = vmatpush3.msra.mxu0 %v128_v47 }
 0x140   :  { %v108_v30 = vpop.f32.mrf.mxu0 }
 0x141   :  { %422 = vmatmul.mubr.f32.vlgmr.msra.gmra.mxu1 %v108_v30 }
 0x142   :  { %v388_v31 = vpop.f32.mrf.mxu0 }
 0x201   :  { %v216_v49 = vpop.f32.mrf.mxu1 }
 0x202   :  { %v217_v50 = vadd.f32 %v326_v48, %v216_v49 }
 0x203   :  { %v423_v51 = vpop.f32.mrf.mxu1 }
 0x204   :  { %v327_v52 = vmul.f32 -1.442695, %v217_v50 }
 0x206   :  { %464 = vpow2.f32 %v327_v52 }
 0x213   :  { %v465_v53 = vpop.eup %464 }
 0x214   :  { %v223_v54 = vadd.f32 1.0, %v465_v53 }
 0x216   :  { %466 = vrcp.f32 %v223_v54 }
 0x223   :  { %v467_v55 = vpop.eup %466 }
 0x224   :  { %v226_v56 = vmul.f32 %v467_v55, %v217_v50 }
 0x226   :  { %457 = vmatmul.mubr.f32.vlgmr.msra.gmra.mxu0 %v226_v56 }
 0x2e6   :  { %v297_v58 = vpop.f32.mrf.mxu0 }
 0x2e7   :  { %v298_v59 = vadd.f32 %v328_v57, %v297_v58 }
 0x2e8   :  { %v458_v60 = vpop.f32.mrf.mxu0 }
 0x2e9   :  { %v329_v61 = vmul.f32 -1.442695, %v298_v59 }
 0x2eb   :  { %468 = vpow2.f32 %v329_v61 }
 0x2f8   :  { %v469_v62 = vpop.eup %468 }
 0x2f9   :  { %v304_v63 = vadd.f32 1.0, %v469_v62 }
 0x2fb   :  { %470 = vrcp.f32 %v304_v63 }
 0x308   :  { %v471_v0 = vpop.eup %470 }
 0x309   :  { %v307_v1 = vmul.f32 %v471_v0, %v298_v59 }
 0x30b   :  { %308 = vst [vmem:[#allocation2] sm:$0xff] %v307_v1 }
 0x30c   :  { %483 = shalt.err (!%p480_p4)
}
 0x30d   :  { %318 = dma.vmem_to_hbm [thread:$0]  %s316_s16, 128, %s702_s4, [#allocation3]  }
 0x30e   :  { %492 = dma.done.wait [#allocation3], 128  }
 0x30f   :  { %493 = vsyncadd [#allocation3], 4294967168 }
 0x310   :  { %322 = vsyncpa [#allocation3], 1 }

</bundles_post_ra>
